<compile_context>
chip_gen: v6e
topology: v6e:2x2x1
jax: 0.10.0
libtpu: 0.0.40
codegen_flags: <defaults>
</compile_context>

<pallas_src>
import functools

import jax
import jax.numpy as jnp
from jax.experimental import pallas as pl
from jax.experimental.pallas import tpu as pltpu

NEG_SLOPE = 0.01   # nn.LeakyReLU default negative_slope
BN_EPS = 1e-5      # nn.BatchNorm1d default eps


def _lrelu(v):
    # max(v, a*v): 2 VALU ops (mul+max) instead of cmp+mul+select.
    return jnp.maximum(v, NEG_SLOPE * v)


# ----------------------------- Pallas kernel --------------------------------
def _make_encoder_kernel(seq_len, pad, kernel_sizes, strides,
                         conv_row_offsets, lin_row_offset, num_conv_layers):
    """Fused encoder kernel for ONE batch element (batch is the grid axis).

    Refs:
      x_ref : (1, seq_len, pad)      bf16, channels lane-padded to `pad`
      w_ref : (total_rows, pad)      bf16, all conv weights (taps folded into
                                     rows, BN scale folded in) + linear weight
      b_ref : (num_layers+1, pad)    f32, conv-bias+BN-shift per layer + linear bias
      out   : (1, 1, pad)            f32
    Scratch: two (seq_len, pad) f32 ping-pong activation buffers.
    """

    def kernel(x_ref, w_ref, b_ref, out_ref, buf_a, buf_b):
        bufs = (buf_a, buf_b)
        # Load this batch element's (L, C_pad) slab into scratch once.
        buf_a[...] = x_ref[0].astype(jnp.float32)

        l_cur = seq_len
        for i in range(num_conv_layers):
            k, s = kernel_sizes[i], strides[i]
            l_out = (l_cur - k) // s + 1
            src, dst = bufs[i % 2], bufs[(i + 1) % 2]

            # im2col: fold the k taps into the contraction dim; spatial
            # positions fill the matmul M dimension.  Each tap is a (strided)
            # sublane slice of the previous layer's activations.
            parts = []
            for t in range(k):
                if s == 1:
                    parts.append(src[pl.ds(t, l_out), :])
                else:
                    parts.append(src[pl.ds(t, l_out, stride=s), :])
            slab = parts[0] if k == 1 else jnp.concatenate(parts, axis=-1)

            w_i = w_ref[pl.ds(conv_row_offsets[i], k * pad), :]   # (k*pad, pad) bf16
            b_i = b_ref[pl.ds(i, 1), :]                           # (1, pad) f32, hoisted
            acc = jnp.dot(slab.astype(jnp.bfloat16), w_i,
                          preferred_element_type=jnp.float32) + b_i
            dst[pl.ds(0, l_out), :] = _lrelu(acc)
            l_cur = l_out

        # Conv stack reduced the spatial dim to exactly 1 (checked in wrapper).
        h = bufs[num_conv_layers % 2][pl.ds(0, 1), :]             # (1, pad)
        w_lin = w_ref[pl.ds(lin_row_offset, pad), :]              # (pad, pad) bf16
        y = jnp.dot(h.astype(jnp.bfloat16), w_lin,
                    preferred_element_type=jnp.float32) \
            + b_ref[pl.ds(num_conv_layers, 1), :]
        out_ref[0] = _lrelu(y).astype(out_ref.dtype)

    return kernel


# ------------------------- one-time parameter packing ------------------------
def pack_params(params, input_channel, output_dim):
    """Fold eval-mode BN into conv weights and pack every layer's weights into a
    single lane-padded bf16 slab (+ one f32 bias slab).  Call ONCE and cache —
    do not redo this per forward call."""
    conv_layers = params["conv_layers"]
    channels = [input_channel] + [int(p["w"].shape[0]) for p in conv_layers]
    pad = max(channels + [int(output_dim)])
    pad = -(-pad // 8) * 8          # sublane-align row offsets inside w_all

    w_blocks, b_rows, row_offsets = [], [], []
    off = 0
    for p in conv_layers:
        c_out, c_in, k = p["w"].shape                      # torch layout (O, I, K)
        scale = p["gamma"] / jnp.sqrt(p["running_var"] + BN_EPS)
        # Fold BN scale into the weights; fold conv bias + BN shift into bias.
        w_eff = (jnp.transpose(p["w"], (2, 1, 0)).astype(jnp.float32)
                 * scale[None, None, :])                   # (k, C_in, C_out)
        w_pad = jnp.zeros((k, pad, pad), jnp.float32).at[:, :c_in, :c_out].set(w_eff)
        w_blocks.append(w_pad.reshape(k * pad, pad))
        b_eff = (p["b"] - p["running_mean"]) * scale + p["beta"]
        b_rows.append(jnp.zeros((pad,), jnp.float32).at[:c_out].set(b_eff))
        row_offsets.append(off)
        off += k * pad

    lin_offset = off
    w_lin = params["proj"]["w"]                            # (output_dim, C_last)
    b_lin = params["proj"]["b"]
    c_last = int(w_lin.shape[1])
    w_blocks.append(jnp.zeros((pad, pad), jnp.float32)
                    .at[:c_last, :output_dim].set(w_lin.T.astype(jnp.float32)))
    b_rows.append(jnp.zeros((pad,), jnp.float32).at[:output_dim].set(b_lin))

    w_all = jnp.concatenate(w_blocks, axis=0).astype(jnp.bfloat16)
    b_all = jnp.stack(b_rows, axis=0).astype(jnp.float32)
    meta = dict(pad=pad, row_offsets=tuple(row_offsets), lin_offset=lin_offset)
    return w_all, b_all, meta


# ------------------------------- forward ------------------------------------
def cnn_encoder_forward(x, w_all, b_all, *, pad, row_offsets, lin_offset,
                        kernel_sizes, strides, output_dim):
    """Full CNNEncoder forward. x: (N, C_in, L) -> (N, output_dim)."""
    batch, c_in, seq_len = x.shape

    # Conv stack must reduce the spatial dim to exactly 1 (as in the spec).
    l_cur = seq_len
    for k, s in zip(kernel_sizes, strides):
        l_cur = (l_cur - k) // s + 1
    assert l_cur == 1, f"CNN output spatial dim must be 1, got {l_cur}"

    # Single cheap input relayout: (N, C, L) -> (N, L, C_pad), bf16 for DMA/MXU.
    x_nlc = jnp.transpose(x, (0, 2, 1)).astype(jnp.bfloat16)
    x_p = jnp.zeros((batch, seq_len, pad), jnp.bfloat16).at[:, :, :c_in].set(x_nlc)

    num_layers = len(kernel_sizes)
    kernel = _make_encoder_kernel(seq_len, pad, tuple(kernel_sizes),
                                  tuple(strides), tuple(row_offsets),
                                  lin_offset, num_layers)

    # NOTE: at realistic batch sizes, bump the batch block above 1 element and
    # re-derive the VMEM budget (v7x: 64 MiB physical); weights keep constant
    # index_maps so only x/out stream across the grid.
    out = pl.pallas_call(
        kernel,
        out_shape=jax.ShapeDtypeStruct((batch, 1, pad), jnp.float32),
        grid_spec=pltpu.PrefetchScalarGridSpec(
            num_scalar_prefetch=0,
            grid=(batch,),
            in_specs=[
                pl.BlockSpec((1, seq_len, pad), lambda b: (b, 0, 0)),
                pl.BlockSpec(w_all.shape, lambda b: (0, 0)),   # VMEM-resident
                pl.BlockSpec(b_all.shape, lambda b: (0, 0)),   # VMEM-resident
            ],
            out_specs=pl.BlockSpec((1, 1, pad), lambda b: (b, 0, 0)),
            scratch_shapes=[pltpu.VMEM((seq_len, pad), jnp.float32),
                            pltpu.VMEM((seq_len, pad), jnp.float32)],
        ),
        compiler_params=pltpu.CompilerParams(
            dimension_semantics=("parallel",),
            vmem_limit_bytes=32 * 1024 * 1024,
        ),
    )(x_p, w_all, b_all)
    return out[:, 0, :output_dim]


# --------------------------- deterministic params ---------------------------
def init_params(key, input_channel, num_channels, kernel_sizes, output_dim):
    params = {"conv_layers": []}
    for i, c_out in enumerate(num_channels):
        c_in = input_channel if i == 0 else num_channels[i - 1]
        k = kernel_sizes[i]
        key, k1, k2, k3, k4, k5, k6 = jax.random.split(key, 7)
        fan_in = c_in * k
        bound = 1.0 / jnp.sqrt(fan_in)
        params["conv_layers"].append({
            "w": jax.random.uniform(k1, (c_out, c_in, k), jnp.float32, -bound, bound),
            "b": jax.random.uniform(k2, (c_out,), jnp.float32, -bound, bound),
            "gamma": 1.0 + 0.1 * jax.random.normal(k3, (c_out,), jnp.float32),
            "beta": 0.1 * jax.random.normal(k4, (c_out,), jnp.float32),
            "running_mean": 0.1 * jax.random.normal(k5, (c_out,), jnp.float32),
            "running_var": 1.0 + 0.1 * jax.random.uniform(k6, (c_out,), jnp.float32),
        })
    c_last = num_channels[-1]
    key, k1, k2 = jax.random.split(key, 3)
    bound = 1.0 / jnp.sqrt(c_last)
    params["proj"] = {
        "w": jax.random.uniform(k1, (output_dim, c_last), jnp.float32, -bound, bound),
        "b": jax.random.uniform(k2, (output_dim,), jnp.float32, -bound, bound),
    }
    return params


# ------------------------------ reference (JAX) ------------------------------
def _reference_forward(x, params, kernel_sizes, strides):
    h = x
    for i, p in enumerate(params["conv_layers"]):
        conv = jax.lax.conv_general_dilated(
            h, p["w"], window_strides=(strides[i],), padding="VALID",
            dimension_numbers=("NCH", "OIH", "NCH"))
        conv = conv + p["b"][None, :, None]
        s = p["gamma"] / jnp.sqrt(p["running_var"] + BN_EPS)
        bn = (conv - p["running_mean"][None, :, None]) * s[None, :, None] \
             + p["beta"][None, :, None]
        h = _lrelu(bn)
    h = h[:, :, 0]
    return _lrelu(h @ params["proj"]["w"].T + params["proj"]["b"])


# ----------------------------------- main ------------------------------------
if __name__ == "__main__":
    # Small config; conv stack must reduce the spatial dim to exactly 1.
    batch = 2
    sequence_length = 8
    input_channel = 4
    num_channels = [8, 16]
    kernel_sizes = [3, 3]
    strides = [2, 1]          # 8 -> 3 -> 1
    output_dim = 32

    key = jax.random.PRNGKey(0)
    kx, kp = jax.random.split(key)
    x = jax.random.normal(kx, (batch, input_channel, sequence_length), jnp.float32)
    params = init_params(kp, input_channel, num_channels, kernel_sizes, output_dim)

    # Fold BN + pack weights ONCE (cached across forward calls).
    w_all, b_all, meta = pack_params(params, input_channel, output_dim)

    fwd = jax.jit(functools.partial(
        cnn_encoder_forward,
        pad=meta["pad"], row_offsets=meta["row_offsets"],
        lin_offset=meta["lin_offset"],
        kernel_sizes=tuple(kernel_sizes), strides=tuple(strides),
        output_dim=output_dim))

    out = fwd(x, w_all, b_all)
    out = jax.block_until_ready(out)

    ref = _reference_forward(x, params, kernel_sizes, strides)
    assert out.shape == (batch, output_dim), out.shape
    # bf16 MXU operands (fp32 accumulation) -> looser tolerance than pure fp32.
    assert jnp.allclose(out, ref, atol=3e-2, rtol=3e-2), \
        f"mismatch: max abs err {jnp.max(jnp.abs(out - ref))}"

    print("KERNEL_OK")
</pallas_src>

<mosaic_0001>
module attributes {stable_mosaic.version = 11 : i64} {
  func.func @kernel(%arg0: i32, %arg1: memref<1x8x32xbf16, #tpu.memory_space<vmem>>, %arg2: memref<224x32xbf16, #tpu.memory_space<vmem>>, %arg3: memref<3x32xf32, #tpu.memory_space<vmem>>, %arg4: memref<1x1x32xf32, #tpu.memory_space<vmem>>, %arg5: memref<8x32xf32, #tpu.memory_space<vmem>>, %arg6: memref<8x32xf32, #tpu.memory_space<vmem>>) attributes {dimension_semantics = [#tpu.dimension_semantics<parallel>], iteration_bounds = array<i64: 2>, scalar_prefetch = 0 : i64, scratch_operands = 2 : i64, tpu.core_type = #tpu.core_type<tc>, window_params = [{transform_indices = @transform_0, window_bounds = array<i64: 1, 8, 32>}, {pipeline_mode = #tpu.pipeline_mode<synchronous>, transform_indices = @transform_1, window_bounds = array<i64: 224, 32>}, {pipeline_mode = #tpu.pipeline_mode<synchronous>, transform_indices = @transform_2, window_bounds = array<i64: 3, 32>}, {transform_indices = @transform_3, window_bounds = array<i64: 1, 1, 32>}]} {
    %c0 = arith.constant 0 : index
    %c0_0 = arith.constant 0 : index
    %c0_1 = arith.constant 0 : index
    %0 = vector.load %arg1[%c0, %c0_0, %c0_1] : memref<1x8x32xbf16, #tpu.memory_space<vmem>>, vector<1x8x32xbf16>
    %1 = vector.shape_cast %0 : vector<1x8x32xbf16> to vector<8x32xbf16>
    %2 = arith.extf %1 : vector<8x32xbf16> to vector<8x32xf32>
    %c0_2 = arith.constant 0 : index
    %c0_3 = arith.constant 0 : index
    %3 = vector.load %arg5[%c0_2, %c0_3] : memref<8x32xf32, #tpu.memory_space<vmem>>, vector<8x32xf32>
    tpu.vector_store %arg5[%c0_2, %c0_3], %2 {strides = array<i32>} : memref<8x32xf32, #tpu.memory_space<vmem>>, vector<8x32xf32>,
    %c0_4 = arith.constant 0 : index
    %c0_5 = arith.constant 0 : index
    %4 = tpu.strided_load %arg5[%c0_4, %c0_5] {strides = array<i32: 2, 1>} : memref<8x32xf32, #tpu.memory_space<vmem>>, vector<3x32xf32>
    %c1 = arith.constant 1 : index
    %c0_6 = arith.constant 0 : index
    %5 = tpu.strided_load %arg5[%c1, %c0_6] {strides = array<i32: 2, 1>} : memref<8x32xf32, #tpu.memory_space<vmem>>, vector<3x32xf32>
    %c2 = arith.constant 2 : index
    %c0_7 = arith.constant 0 : index
    %6 = tpu.strided_load %arg5[%c2, %c0_7] {strides = array<i32: 2, 1>} : memref<8x32xf32, #tpu.memory_space<vmem>>, vector<3x32xf32>
    %7 = tpu.concatenate %4, %5, %6 in 1 : vector<3x32xf32>, vector<3x32xf32>, vector<3x32xf32> -> vector<3x96xf32>
    %c0_8 = arith.constant 0 : index
    %c0_9 = arith.constant 0 : index
    %8 = vector.load %arg2[%c0_8, %c0_9] : memref<224x32xbf16, #tpu.memory_space<vmem>>, vector<96x32xbf16>
    %c0_10 = arith.constant 0 : index
    %c0_11 = arith.constant 0 : index
    %9 = vector.load %arg3[%c0_10, %c0_11] : memref<3x32xf32, #tpu.memory_space<vmem>>, vector<1x32xf32>
    %10 = arith.truncf %7 : vector<3x96xf32> to vector<3x96xbf16>
    %cst = arith.constant dense<0.000000e+00> : vector<3x32xf32>
    %11 = tpu.matmul %10, %8, %cst {dimension_numbers = #tpu.dot_dimension_numbers<[1], [0], [0], [1], [0, 0, 1, 1], [], []>} : vector<3x96xbf16>, vector<96x32xbf16>, vector<3x32xf32> -> vector<3x32xf32>
    %12 = vector.broadcast %9 : vector<1x32xf32> to vector<3x32xf32>
    %13 = arith.addf %11, %12 : vector<3x32xf32>
    %cst_12 = arith.constant 0.00999999977 : f32
    %14 = vector.broadcast %cst_12 : f32 to vector<3x32xf32>
    %15 = arith.mulf %14, %13 : vector<3x32xf32>
    %16 = arith.maximumf %13, %15 : vector<3x32xf32>
    %c0_13 = arith.constant 0 : index
    %c0_14 = arith.constant 0 : index
    %17 = vector.load %arg6[%c0_13, %c0_14] : memref<8x32xf32, #tpu.memory_space<vmem>>, vector<3x32xf32>
    tpu.vector_store %arg6[%c0_13, %c0_14], %16 {strides = array<i32>} : memref<8x32xf32, #tpu.memory_space<vmem>>, vector<3x32xf32>,
    %c0_15 = arith.constant 0 : index
    %c0_16 = arith.constant 0 : index
    %18 = vector.load %arg6[%c0_15, %c0_16] : memref<8x32xf32, #tpu.memory_space<vmem>>, vector<1x32xf32>
    %c1_17 = arith.constant 1 : index
    %c0_18 = arith.constant 0 : index
    %19 = vector.load %arg6[%c1_17, %c0_18] : memref<8x32xf32, #tpu.memory_space<vmem>>, vector<1x32xf32>
    %c2_19 = arith.constant 2 : index
    %c0_20 = arith.constant 0 : index
    %20 = vector.load %arg6[%c2_19, %c0_20] : memref<8x32xf32, #tpu.memory_space<vmem>>, vector<1x32xf32>
    %21 = tpu.concatenate %18, %19, %20 in 1 : vector<1x32xf32>, vector<1x32xf32>, vector<1x32xf32> -> vector<1x96xf32>
    %c96 = arith.constant 96 : index
    %c0_21 = arith.constant 0 : index
    %22 = vector.load %arg2[%c96, %c0_21] : memref<224x32xbf16, #tpu.memory_space<vmem>>, vector<96x32xbf16>
    %c1_22 = arith.constant 1 : index
    %c0_23 = arith.constant 0 : index
    %23 = vector.load %arg3[%c1_22, %c0_23] : memref<3x32xf32, #tpu.memory_space<vmem>>, vector<1x32xf32>
    %24 = arith.truncf %21 : vector<1x96xf32> to vector<1x96xbf16>
    %cst_24 = arith.constant dense<0.000000e+00> : vector<1x32xf32>
    %25 = tpu.matmul %24, %22, %cst_24 {dimension_numbers = #tpu.dot_dimension_numbers<[1], [0], [0], [1], [0, 0, 1, 1], [], []>} : vector<1x96xbf16>, vector<96x32xbf16>, vector<1x32xf32> -> vector<1x32xf32>
    %26 = arith.addf %25, %23 : vector<1x32xf32>
    %cst_25 = arith.constant 0.00999999977 : f32
    %27 = vector.broadcast %cst_25 : f32 to vector<1x32xf32>
    %28 = arith.mulf %27, %26 : vector<1x32xf32>
    %29 = arith.maximumf %26, %28 : vector<1x32xf32>
    %c0_26 = arith.constant 0 : index
    %c0_27 = arith.constant 0 : index
    %30 = vector.load %arg5[%c0_26, %c0_27] : memref<8x32xf32, #tpu.memory_space<vmem>>, vector<1x32xf32>
    tpu.vector_store %arg5[%c0_26, %c0_27], %29 {strides = array<i32>} : memref<8x32xf32, #tpu.memory_space<vmem>>, vector<1x32xf32>,
    %c0_28 = arith.constant 0 : index
    %c0_29 = arith.constant 0 : index
    %31 = vector.load %arg5[%c0_28, %c0_29] : memref<8x32xf32, #tpu.memory_space<vmem>>, vector<1x32xf32>
    %c192 = arith.constant 192 : index
    %c0_30 = arith.constant 0 : index
    %32 = vector.load %arg2[%c192, %c0_30] : memref<224x32xbf16, #tpu.memory_space<vmem>>, vector<32x32xbf16>
    %33 = arith.truncf %31 : vector<1x32xf32> to vector<1x32xbf16>
    %cst_31 = arith.constant dense<0.000000e+00> : vector<1x32xf32>
    %34 = tpu.matmul %33, %32, %cst_31 {dimension_numbers = #tpu.dot_dimension_numbers<[1], [0], [0], [1], [0, 0, 1, 1], [], []>} : vector<1x32xbf16>, vector<32x32xbf16>, vector<1x32xf32> -> vector<1x32xf32>
    %c2_32 = arith.constant 2 : index
    %c0_33 = arith.constant 0 : index
    %35 = vector.load %arg3[%c2_32, %c0_33] : memref<3x32xf32, #tpu.memory_space<vmem>>, vector<1x32xf32>
    %36 = arith.addf %34, %35 : vector<1x32xf32>
    %cst_34 = arith.constant 0.00999999977 : f32
    %37 = vector.broadcast %cst_34 : f32 to vector<1x32xf32>
    %38 = arith.mulf %37, %36 : vector<1x32xf32>
    %39 = arith.maximumf %36, %38 : vector<1x32xf32>
    %c0_35 = arith.constant 0 : index
    %c0_36 = arith.constant 0 : index
    %c0_37 = arith.constant 0 : index
    %40 = vector.load %arg4[%c0_35, %c0_36, %c0_37] : memref<1x1x32xf32, #tpu.memory_space<vmem>>, vector<1x1x32xf32>
    %41 = vector.shape_cast %40 : vector<1x1x32xf32> to vector<1x32xf32>
    %42 = vector.shape_cast %39 : vector<1x32xf32> to vector<1x1x32xf32>
    tpu.vector_store %arg4[%c0_35, %c0_36, %c0_37], %42 {strides = array<i32>} : memref<1x1x32xf32, #tpu.memory_space<vmem>>, vector<1x1x32xf32>,
    return
  }
  func.func @transform_0(%arg0: i32) -> (i32, i32, i32) {
    %c0_i32 = arith.constant 0 : i32
    %c0_i32_0 = arith.constant 0 : i32
    %c0_i32_1 = arith.constant 0 : i32
    return %arg0, %c0_i32, %c0_i32_0 : i32, i32, i32
  }
  func.func @transform_1(%arg0: i32) -> (i32, i32) {
    %c0_i32 = arith.constant 0 : i32
    %c0_i32_0 = arith.constant 0 : i32
    %c0_i32_1 = arith.constant 0 : i32
    return %c0_i32, %c0_i32_0 : i32, i32
  }
  func.func @transform_2(%arg0: i32) -> (i32, i32) {
    %c0_i32 = arith.constant 0 : i32
    %c0_i32_0 = arith.constant 0 : i32
    %c0_i32_1 = arith.constant 0 : i32
    return %c0_i32, %c0_i32_0 : i32, i32
  }
  func.func @transform_3(%arg0: i32) -> (i32, i32, i32) {
    %c0_i32 = arith.constant 0 : i32
    %c0_i32_0 = arith.constant 0 : i32
    %c0_i32_1 = arith.constant 0 : i32
    return %arg0, %c0_i32, %c0_i32_0 : i32, i32, i32
  }
}

</mosaic_0001>

<bundles_post_ra>
// kernel: cnn_encoder_forward.1
= control target key start
LH: loop header
LB: loop body
LE: loop exit
PB: predicated region body
PF: predicated region fallthrough
CT: control target
= control target key end

     0   :  { %8 = vsyncpa [#allocation5], 0  ;;  %s936_s0 = inlined_call_operand.vmem [shape: bf16[2,8,32], index: 0, kind: input, shape index: {}]   ;;  %s937_s1 = inlined_call_operand.vmem [shape: bf16[224,32], index: 1, kind: input, shape index: {}]   ;;  %s938_s2 = inlined_call_operand.vmem [shape: f32[3,32], index: 2, kind: input, shape index: {}]   ;;  %s939_s3 = inlined_call_operand.hbm [shape: f32[2,1,32], index: 3, kind: output, shape index: {}]  }
   0x1   :  { %10 = vsyncpa [#allocation5 + $0x1], 0  ;;  %s758_s12 = smov 0   ;;  %s760_s13 = smov 0  }
   0x2   :  { %s762_s14 = smov 0   ;;  %s764_s15 = smov 0  }
   0x3 LB: > { %s779_s16 = sadd.s32 4294967295, %s731_s15   ;;  %s531_s17 = sadd.s32 4294967294, %s731_s15   ;;  %s731_s15 = sphi %s764_s15, %s945_s15   ;;  %s727_s14 = sphi %s762_s14, %s944_s14   ;;  %s723_s13 = sphi %s760_s13, %s943_s13   ;;  %s719_s12 = sphi %s758_s12, %s942_s12  }
   0x4   : > { %s783_s18 = sadd.s32 1, %s731_s15   ;;  %s91_s19 = sadd.s32 1, %s727_s14 }
   0x5   : > { %s88_s20 = ssub.s32 %s731_s15, %s783_s18  ;;  %p101_p0 = scmp.ne.s32.totalorder %s727_s14, %s723_s13 }
   0x6   : > { %p89_p1 = scmp.eq.s32.totalorder %s88_s20, 0  ;;  %p102_p2 = scmp.eq.s32.totalorder %s779_s16, 1 }
   0x7   : > { %p107_p3 = scmp.ne.s32.totalorder %s723_s13, %s719_s12  ;;  %p108_p4 = scmp.eq.s32.totalorder %s531_s17, 1 }
   0x8   : > { %s794_s21 = scalar_select %p89_p1, %s727_s14, %s91_s19  }
   0x9   : > { %p796_p5 = por %p102_p2, %p101_p0  ;;  %p800_p6 = por %p108_p4, %p107_p3 }
   0xa   : > { %p534_p7 = scmp.ge.s32.totalorder %s731_s15, 1  ;;  %p139_p8 = scmp.lt.s32.totalorder %s731_s15, 3 }
   0xc   : > { %p140_p9 = pnand %p534_p7, %p139_p8 }
   0xd   : > { %p161_p10 = scmp.lt.s32.totalorder (!%p140_p9), %s779_s16, 1  ;;  %s735_s17 = smov (!%p140_p9), 32  }
   0xe   : > { %143 = sbr.rel (%p140_p9) target bundleno = 906 (0x38a), region = 32  ;;  %s736_s24 = smov (!%p140_p9), 64  }
   0xf   : > { %s159_s27 = sand.u32 (!%p140_p9), 1, %s723_s13   ;;  %s554_s30 = sshll.u32 (!%p140_p9), %s779_s16, 4 }
  0x10   : > { %s160_s4 = scalar_lea.vmem (!%p140_p9), [#allocation4], %s159_s27  ;;  %s900_s8 = scalar_lea.hbm (!%p140_p9), %s939_s3, %s554_s30 }
  0x11   : > { %s464_s9 = scalar_lea.sflag (!%p140_p9), [#allocation5], %s159_s27 }
  0x13   : > { %v733_v0 = vmov 0.0   ;;  %v657_v1 = vld [vmem:[%s937_s1 + $0x28] sm:$0xff]   ;;  %s162_s26 = scalar_select %p161_p10, %s779_s16, 1  ;;  %v658_v2 = vld [vmem:[%s937_s1 + $0x20] sm:$0xff]   ;;  %vm168_vm0 = vcmask 261120   ;;  %v659_v4 = vld [vmem:[%s937_s1 + $0x18] sm:$0xff]  }
  0x14   : > { %574 = vmatprep.subr.bf16.mxu0 %v733_v0  ;;  %590 = vmatprep.subr.bf16.mxu1 %v733_v0  ;;  %vm734_vm1 = vmmov 0   ;;  %v660_v6 = vld [vmem:[%s937_s1 + $0x10] sm:$0xff]   ;;  %v661_v7 = vld [vmem:[%s937_s1 + $0x8] sm:$0xff]   ;;  %v662_v10 = vld [vmem:[%s937_s1] sm:$0xff]   ;;  %vm184_vm2 = vcmask 523264   ;;  %vm240_vm3 = vcmask 785408  }
  0x15   : > { %575 = vmatpush3.bf16.msra.mxu0 %v657_v1  ;;  %s535_s29 = sshll.u32 %s162_s26, 2  ;;  %586 = vmatprep.mubr.msk.bf16.mxu0 %vm734_vm1, %v733_v0  ;;  %v663_v17 = vld [vmem:[%s937_s1 + $0x58] sm:$0xff]   ;;  %v664_v18 = vld [vmem:[%s937_s1 + $0x50] sm:$0xff]   ;;  %v665_v19 = vld [vmem:[%s937_s1 + $0x48] sm:$0xff]   ;;  %vm286_vm4 = vcmask 256000   ;;  %vm396_vm5 = vcmask 253952  }
  0x16   : > { %576 = vmatprep.subr.bf16.mxu0 %v733_v0  ;;  %s164_s5 = scalar_lea.vmem %s936_s0, %s535_s29  ;;  %602 = vmatprep.mubr.msk.bf16.mxu1 %vm734_vm1, %v733_v0  ;;  %v666_v20 = vld [vmem:[%s937_s1 + $0x40] sm:$0xff]   ;;  %v667_v23 = vld [vmem:[%s937_s1 + $0x38] sm:$0xff]   ;;  %v668_v28 = vld [vmem:[%s937_s1 + $0x30] sm:$0xff]   ;;  %s737_s16 = smov [#allocation4]  }
  0x17   : > { %v166_v3 = vld [vmem:[%s164_s5] sm:$0xf]  ;;  %591 = vmatpush3.bf16.msra.mxu1 %v663_v17  ;;  %v669_v39 = vld [vmem:[%s937_s1 + $0x68] sm:$0xff]   ;;  %s476_s5 = sshll.u32 %s160_s4, 4  ;;  %s675_s11 = sshll.u32 %s737_s16, 4  ;;  %s477_s5 = int_to_ptr.vmem [resolvable:$true] %s476_s5  ;;  %s676_s11 = int_to_ptr.vmem [resolvable:$false] %s675_s11 }
  0x18   : > { %v167_v5 = vunpack.c.l.bf16 %v166_v3  ;;  %592 = vmatprep.subr.bf16.mxu1 %v733_v0  ;;  %v536_v21 = vld [vmem:[%s938_s2] ss:$0 sm:$0xff]  ;;  %v313_v41 = vld [vmem:[%s938_s2 + $0x1] sm:$0x1]  ;;  %v404_v51 = vld [vmem:[%s938_s2 + $0x2] sm:$0x1]  ;;  %p678_p0 = scmp.lt.s32.totalorder %s477_s5, %s676_s11 }
  0x19   : > { %577 = vmatpush3.bf16.msra.mxu0 %v658_v2  ;;  %v670_v40 = vld [vmem:[%s937_s1 + $0x60] sm:$0xff]   ;;  %s671_s10 = scalar_lea.vmem %s477_s5, 16  ;;  %s677_s19 = scalar_lea.vmem %s676_s11, 32 }
  0x1a   : > { %578 = vmatprep.subr.bf16.mxu0 %v733_v0  ;;  %169 = vst.msk [vmem:[#allocation2] sm:$0xff] %vm168_vm0, %v167_v5  ;;  %p672_p11 = scmp.ne.s32.totalorder %s477_s5, %s671_s10  ;;  %p679_p1 = scmp.lt.s32.totalorder %s677_s19, %s671_s10 }
  0x1b   : > { %593 = vmatpush3.bf16.msra.mxu1 %v664_v18 }
  0x1c   : > { %594 = vmatprep.subr.bf16.mxu1 %v733_v0  ;;  %p673_p12 = pnand %p672_p11, %p796_p5  ;;  %p680_p2 = por %p679_p1, %p678_p0 }
  0x1d   : > { %579 = vmatpush3.bf16.msra.mxu0 %v659_v4 }
  0x1e   : > { %580 = vmatprep.subr.bf16.mxu0 %v733_v0  ;;  %p674_p13 = pneg %p673_p12 }
  0x1f   : > { %595 = vmatpush3.bf16.msra.mxu1 %v665_v19 }
  0x20   : > { %596 = vmatprep.subr.bf16.mxu1 %v733_v0  ;;  %p681_p3 = pnand %p680_p2, %p674_p13 }
  0x21   : > { %581 = vmatpush3.bf16.msra.mxu0 %v660_v6  ;;  %v172_v8 = vld [vmem:[#allocation2 + $0x1] ss:$2 sm:$0x7]  ;;  %v174_v9 = vld [vmem:[#allocation2 + $0x2] ss:$2 sm:$0x7] }
  0x22   : > { %582 = vmatprep.subr.bf16.mxu0 %v733_v0  ;;  %176 = vrot.lane.b32.xlu0 %v172_v8, %s735_s17  ;;  %v170_v12 = vld [vmem:[#allocation2] ss:$2 sm:$0x7] }
  0x23   : > { %597 = vmatpush3.bf16.msra.mxu1 %v666_v20 }
  0x24   : > { %598 = vmatprep.subr.bf16.mxu1 %v733_v0 }
  0x25   : > { %583 = vmatpush3.bf16.msra.mxu0 %v661_v7 }
  0x26   : > { %584 = vmatprep.subr.bf16.mxu0 %v733_v0  ;;  %180 = vrot.lane.b32.xlu0 %v174_v9, %s736_s24 }
  0x27   : > { %599 = vmatpush3.bf16.msra.mxu1 %v667_v23 }
  0x28   : > { %600 = vmatprep.subr.bf16.mxu1 %v733_v0 }
  0x29   : > { %585 = vmatpush3.bf16.msra.mxu0 %v662_v10 }
  0x2a   : > { %606 = vmatprep.subr.bf16.mxu0 %v733_v0 }
  0x2b   : > { %601 = vmatpush3.bf16.msra.mxu1 %v668_v28 }
  0x94   : > { %v177_v11 = vpop.permute.xlu0 %176 }
  0x95   : > { %v183_v13 = vsel %vm168_vm0, %v170_v12, %v177_v11 }
  0x98   : > { %v181_v14 = vpop.permute.xlu0 %180 }
  0x99   : > { %v185_v15 = vsel %vm184_vm2, %v183_v13, %v181_v14 }
  0x9a   : > { %v199_v16 = vpack.c.bf16 %v185_v15, %v185_v15 }
  0x9c   : > { %587 = vmatmul.mubr.msk.bf16.vlgmr.msra.gmra.mxu0 %vm240_vm3, %v199_v16 }
  0x9d   : > { %610 = vmatprep.mubr.msk.bf16.mxu0 %vm734_vm1, %v733_v0  ;;  %607 = vmatpush3.bf16.msra.mxu0 %v669_v39 }
  0x9e   : > { %608 = vmatprep.subr.bf16.mxu0 %v733_v0 }
  0xa1   : > { %609 = vmatpush3.bf16.msra.mxu0 %v670_v40 }
 0x15c   : > { %v278_v22 = vpop.f32.mrf.mxu0 }
 0x15d   : > { %v279_v24 = vadd.f32 %v536_v21, %v278_v22 }
 0x15e   : > { %v588_v25 = vpop.f32.mrf.mxu0 }
 0x15f   : > { %v284_v26 = vmul.f32 0.01, %v279_v24 }
 0x160   : > { %v281_v27 = vpop.f32.mrf.mxu0 }
 0x161   : > { %v285_v29 = vmax.f32 %v279_v24, %v284_v26 }
 0x162   : > { %v589_v30 = vpop.f32.mrf.mxu0 }
 0x163   : > { %287 = vst.msk [vmem:[#allocation3] sm:$0x7] %vm286_vm4, %v285_v29 }
 0x16a   : > { %v289_v31 = vld [vmem:[#allocation3 + $0x1] sm:$0x1]  ;;  %v290_v32 = vld [vmem:[#allocation3 + $0x2] sm:$0x1]  ;;  %v288_v34 = vld [vmem:[#allocation3] sm:$0x1] }
 0x16b   : > { %292 = vrot.lane.b32.xlu1 %v289_v31, %s735_s17 }
 0x16f   : > { %296 = vrot.lane.b32.xlu1 %v290_v32, %s736_s24 }
 0x1dd   : > { %v293_v33 = vpop.permute.xlu1 %292 }
 0x1de   : > { %v299_v35 = vsel %vm168_vm0, %v288_v34, %v293_v33 }
 0x1e1   : > { %v297_v36 = vpop.permute.xlu1 %296 }
 0x1e2   : > { %v300_v37 = vsel %vm184_vm2, %v299_v35, %v297_v36 }
 0x1e3   : > { %v314_v38 = vpack.c.bf16 %v300_v37, %v300_v37 }
 0x1e5   : > { %603 = vmatmul.mubr.msk.bf16.vlgmr.msra.gmra.mxu1 %vm240_vm3, %v314_v38 }
 0x2a5   : > { %v388_v42 = vpop.f32.mrf.mxu1 }
 0x2a6   : > { %v389_v43 = vadd.f32 %v388_v42, %v313_v41 }
 0x2a7   : > { %v604_v44 = vpop.f32.mrf.mxu1 }
 0x2a8   : > { %v394_v45 = vmul.f32 0.01, %v389_v43 }
 0x2a9   : > { %v391_v46 = vpop.f32.mrf.mxu1 }
 0x2aa   : > { %v395_v47 = vmax.f32 %v389_v43, %v394_v45 }
 0x2ab   : > { %v605_v48 = vpop.f32.mrf.mxu1 }
 0x2ac   : > { %397 = vst.msk [vmem:[#allocation2] sm:$0x1] %vm396_vm5, %v395_v47 }
 0x2b3   : > { %v398_v49 = vld [vmem:[#allocation2] sm:$0x1] }
 0x2b4   : > { %v403_v50 = vpack.c.bf16 %v398_v49, %v398_v49 }
 0x2b6   : > { %611 = vmatmul.mubr.msk.bf16.vlgmr.msra.gmra.mxu0 %vm168_vm0, %v403_v50 }
 0x376   : > { %v454_v52 = vpop.f32.mrf.mxu0 }
 0x377   : > { %v455_v53 = vadd.f32 %v454_v52, %v404_v51 }
 0x378   : > { %v612_v54 = vpop.f32.mrf.mxu0 }
 0x379   : > { %v460_v55 = vmul.f32 0.01, %v455_v53 }
 0x37a   : > { %v457_v56 = vpop.f32.mrf.mxu0 }
 0x37b   : > { %v461_v57 = vmax.f32 %v455_v53, %v460_v55 }
 0x37c   : > { %v613_v58 = vpop.f32.mrf.mxu0 }
 0x37d   : > { %462 = vst.msk [vmem:[%s160_s4] sm:$0x1] %vm396_vm5, %v461_v57 }
 0x37e   : > { %684 = shalt.err (!%p681_p3)
}
 0x37f   : > { %s685_s20 = scalar_lea.hbm %s900_s8, 16  ;;  %s689_s24 = scalar_lea.hbm %s939_s3, 32 }
 0x380   : > { %p686_p4 = scmp.ne.s32.totalorder %s900_s8, %s685_s20  ;;  %p690_p9 = scmp.lt.s32.totalorder %s900_s8, %s939_s3 }
 0x381   : > { %p691_p10 = scmp.lt.s32.totalorder %s689_s24, %s685_s20 }
 0x382   : > { %p687_p7 = pnand %p686_p4, %p796_p5 }
 0x383   : > { %p692_p11 = por %p691_p10, %p690_p9 }
 0x384   : > { %p688_p8 = pneg %p687_p7 }
 0x386   : > { %p693_p12 = pnand %p692_p11, %p688_p8 }
 0x388   : > { %696 = shalt.err (!%p693_p12)
}
 0x389   : > { %614 = dma.vmem_to_hbm [thread:$0]  (%p796_p5), %s477_s5, 16, %s900_s8, %s464_s9  }
 0x38a PF: > { %p620_p13 = scmp.ge.s32.totalorder %s731_s15, 2  ;;  %s488_s28 = sand.u32 1, %s719_s12  }
 0x38b   : > { %s489_s29 = scalar_lea.sflag [#allocation5], %s488_s28 }
 0x38c   : > { %p617_p0 = pnand %p620_p13, %p800_p6 }
 0x38e   : > { %p618_p1 = pneg %p617_p0 }
 0x390   : > { %714 = dma.done.wait (%p618_p1), %s489_s29, 16  }
 0x391   : > { %716 = vsyncadd (%p618_p1), %s489_s29, 4294967280  ;;  %p13_p2 = scmp.ge.s32.totalorder %s783_s18, 4   ;;  %s942_s12 = smov %s723_s13 }
 0x392   : > { %s943_s13 = smov %s727_s14  ;;  %s944_s14 = smov %s794_s21 }
 0x393   : > { %s945_s15 = smov %s783_s18  ;;  %15 = sbr.rel (!%p13_p2) target bundleno = 3 (0x3), region = 69 }
 0x398   :  { %493 = vsyncpa [#allocation5], 1 }
 0x399   :  { %495 = vsyncpa [#allocation5 + $0x1], 1 }

</bundles_post_ra>
